<compile_context>
chip_gen: v6e
topology: v6e:2x2x1
jax: 0.10.0
libtpu: 0.0.40
codegen_flags: <defaults>
</compile_context>

<pallas_src>
import functools
import math

import jax
import jax.numpy as jnp
from jax.experimental import pallas as pl
from jax.experimental.pallas import tpu as pltpu

LN_EPS = 1e-12
_VMEM_LIMIT_BYTES = 48 * 1024 * 1024       # > 32 MiB default, < v7x 64 MiB physical
_ROW_TILE_BUDGET_BYTES = 16 * 1024 * 1024  # working-set budget for row tiles


def _round_up(x, m):
    return (x + m - 1) // m * m


def _tf_layer_norm(x, gamma, beta, eps):
    # TF-style LayerNorm: biased variance, eps inside the sqrt.  Two-pass form
    # kept to match the PyTorch reference numerics exactly.
    u = jnp.mean(x, axis=-1, keepdims=True)
    d = x - u
    s = jnp.mean(d * d, axis=-1, keepdims=True)
    return gamma * (d * jax.lax.rsqrt(s + eps)) + beta


# ----------------------- kernel 1: self-attention + LN1 ---------------------

def _attn_ln1_kernel(x_ref, wq_ref, bq_ref, g1_ref, be1_ref, o_ref, *,
                     eps, inv_sqrt_h):
    x = x_ref[...].astype(jnp.float32)                       # (S, H)
    wq_t = wq_ref[...].astype(jnp.float32)                   # (H, H) == W_q^T
    bq = bq_ref[...].astype(jnp.float32)                     # (1, H)

    # The original module computes Q, K and V all with self.query.
    q = jnp.dot(x, wq_t, preferred_element_type=jnp.float32) + bq    # (S, H)

    # scores = Q @ K^T / sqrt(H), with K == Q (contract hidden of both).
    scores = jax.lax.dot_general(
        q, q, (((1,), (1,)), ((), ())),
        preferred_element_type=jnp.float32) * inv_sqrt_h              # (S, S)

    m = jnp.max(scores, axis=-1, keepdims=True)
    p = jnp.exp(scores - m)
    probs = p / jnp.sum(p, axis=-1, keepdims=True)
    attn = jnp.dot(probs, q, preferred_element_type=jnp.float32)      # (S, H)

    y = _tf_layer_norm(attn,
                       g1_ref[...].astype(jnp.float32),
                       be1_ref[...].astype(jnp.float32), eps)
    o_ref[...] = y.astype(o_ref.dtype)


def self_attention_layernorm(x, wq, bq, ln_w, ln_b, eps=LN_EPS):
    """x: (B, S, H); wq: torch-layout (out, in). Returns LayerNorm1(attn(x))."""
    B, S, H = x.shape
    inv_sqrt_h = 1.0 / math.sqrt(H)
    wq_t = jnp.transpose(wq)            # kernel computes plain x @ wq_t + bq
    bq2 = bq.reshape(1, H)
    g1 = ln_w.reshape(1, H)
    be1 = ln_b.reshape(1, H)

    cost = pl.CostEstimate(
        flops=B * (2 * S * H * H + 4 * S * S * H + 10 * S * H),
        transcendentals=B * (S * S + S),
        bytes_accessed=4 * (2 * B * S * H + H * H + 3 * H))

    return pl.pallas_call(
        functools.partial(_attn_ln1_kernel, eps=eps, inv_sqrt_h=inv_sqrt_h),
        out_shape=jax.ShapeDtypeStruct((B, S, H), x.dtype),
        grid=(B,),
        in_specs=[
            pl.BlockSpec((None, S, H), lambda b: (b, 0, 0)),
            pl.BlockSpec((H, H), lambda b: (0, 0)),   # resident (constant map)
            pl.BlockSpec((1, H), lambda b: (0, 0)),
            pl.BlockSpec((1, H), lambda b: (0, 0)),
            pl.BlockSpec((1, H), lambda b: (0, 0)),
        ],
        out_specs=pl.BlockSpec((None, S, H), lambda b: (b, 0, 0)),
        compiler_params=pltpu.CompilerParams(
            dimension_semantics=("parallel",),
            vmem_limit_bytes=_VMEM_LIMIT_BYTES),
        cost_estimate=cost,
    )(x, wq_t, bq2, g1, be1)


# ------------------- kernel 2: FFN + residual + LN2 -------------------------

def _ffn_ln2_kernel(x_ref, w1_ref, b1_ref, w2_ref, b2_ref, g2_ref, be2_ref,
                    o_ref, *, eps):
    x = x_ref[...].astype(jnp.float32)                                # (T, H)
    h = jnp.dot(x, w1_ref[...].astype(jnp.float32),
                preferred_element_type=jnp.float32)
    h = h + b1_ref[...].astype(jnp.float32)
    # torch nn.GELU(); tanh approximation used (exact erf-GELU has no
    # guaranteed Mosaic lowering).  Dropout is identity at inference.
    h = jax.nn.gelu(h, approximate=True)
    y = jnp.dot(h, w2_ref[...].astype(jnp.float32),
                preferred_element_type=jnp.float32)
    y = y + b2_ref[...].astype(jnp.float32) + x                       # residual
    y = _tf_layer_norm(y, g2_ref[...].astype(jnp.float32),
                       be2_ref[...].astype(jnp.float32), eps)
    o_ref[...] = y.astype(o_ref.dtype)


def _choose_row_tile(rows, hidden, dtype_bytes):
    # Working set per row: double-buffered in/out tile (dtype) plus ~4 f32
    # temporaries live in the body.
    per_row = hidden * (4 * dtype_bytes + 4 * 4)
    cap = max(8, _ROW_TILE_BUDGET_BYTES // per_row)
    cap = max(8, (cap // 8) * 8)            # multiple of the f32 sublane tile
    cap = min(cap, 1024)                    # bound per-step latency
    tile = min(cap, _round_up(rows, 8))
    # Prefer >= 2 grid steps so both v7x TensorCores get work.
    if _round_up(rows, tile) // tile < 2 and rows >= 16:
        tile = max(8, _round_up(_round_up(rows, 8) // 2, 8))
    return tile


def ffn_residual_layernorm(x, w1, b1, w2, b2, ln_w, ln_b, eps=LN_EPS):
    """x: (..., H). Returns LayerNorm2(linear2(gelu(linear1(x))) + x)."""
    orig_shape = x.shape
    H = orig_shape[-1]
    rows = 1
    for d in orig_shape[:-1]:
        rows *= d
    x2 = x.reshape(rows, H)

    tile = _choose_row_tile(rows, H, jnp.dtype(x.dtype).itemsize)
    rows_p = _round_up(rows, tile)
    if rows_p != rows:
        x2 = jnp.pad(x2, ((0, rows_p - rows), (0, 0)))

    w1_t = jnp.transpose(w1)
    w2_t = jnp.transpose(w2)
    b1_2 = b1.reshape(1, H)
    b2_2 = b2.reshape(1, H)
    g2 = ln_w.reshape(1, H)
    be2 = ln_b.reshape(1, H)

    cost = pl.CostEstimate(
        flops=rows_p * (4 * H * H + 24 * H),
        transcendentals=rows_p * (H + 1),
        bytes_accessed=4 * (2 * rows_p * H + 2 * H * H + 4 * H))

    out = pl.pallas_call(
        functools.partial(_ffn_ln2_kernel, eps=eps),
        out_shape=jax.ShapeDtypeStruct((rows_p, H), x.dtype),
        grid=(rows_p // tile,),
        in_specs=[
            pl.BlockSpec((tile, H), lambda i: (i, 0)),
            pl.BlockSpec((H, H), lambda i: (0, 0)),    # resident weights
            pl.BlockSpec((1, H), lambda i: (0, 0)),
            pl.BlockSpec((H, H), lambda i: (0, 0)),
            pl.BlockSpec((1, H), lambda i: (0, 0)),
            pl.BlockSpec((1, H), lambda i: (0, 0)),
            pl.BlockSpec((1, H), lambda i: (0, 0)),
        ],
        out_specs=pl.BlockSpec((tile, H), lambda i: (i, 0)),
        compiler_params=pltpu.CompilerParams(
            dimension_semantics=("parallel",),
            vmem_limit_bytes=_VMEM_LIMIT_BYTES),
        cost_estimate=cost,
    )(x2, w1_t, b1_2, w2_t, b2_2, g2, be2)
    return out[:rows].reshape(orig_shape)


# ------------------------------ full forward ---------------------------------

def gmm_higher_order_projection_forward(gmm_embedding,
                                        relation_transition_embedding,
                                        params, eps=LN_EPS):
    # normalized_gmm_embedding = gmm_embedding  (no-op in the original forward)
    h = self_attention_layernorm(gmm_embedding, params["wq"], params["bq"],
                                 params["ln1_w"], params["ln1_b"], eps)
    h = ffn_residual_layernorm(h, params["ffn_w1"], params["ffn_b1"],
                               params["ffn_w2"], params["ffn_b2"],
                               params["ln2_w"], params["ln2_b"], eps)
    # TODO(synk): self.gmmProjection is a constructor-injected module with an
    # unknown forward; it is treated as identity here and
    # relation_transition_embedding is left unused.
    del relation_transition_embedding
    return h


if __name__ == "__main__":
    hidden_dim = 128                  # -> H = 3 * hidden_dim = 384 (lane-dense)
    H = 3 * hidden_dim
    batch, num_particles = 2, 8

    key = jax.random.PRNGKey(0)
    keys = jax.random.split(key, 8)
    scale = 1.0 / math.sqrt(H)
    params = {
        "wq": jax.random.normal(keys[0], (H, H), jnp.float32) * scale,
        "bq": jax.random.normal(keys[1], (H,), jnp.float32) * 0.02,
        "ln1_w": jnp.ones((H,), jnp.float32),
        "ln1_b": jnp.zeros((H,), jnp.float32),
        "ffn_w1": jax.random.normal(keys[2], (H, H), jnp.float32) * scale,
        "ffn_b1": jax.random.normal(keys[3], (H,), jnp.float32) * 0.02,
        "ffn_w2": jax.random.normal(keys[4], (H, H), jnp.float32) * scale,
        "ffn_b2": jax.random.normal(keys[5], (H,), jnp.float32) * 0.02,
        "ln2_w": jnp.ones((H,), jnp.float32),
        "ln2_b": jnp.zeros((H,), jnp.float32),
    }
    gmm_embedding = jax.random.normal(keys[6], (batch, num_particles, H),
                                      jnp.float32)
    relation_transition_embedding = jax.random.normal(keys[7], (batch, H),
                                                      jnp.float32)

    y = gmm_higher_order_projection_forward(
        gmm_embedding, relation_transition_embedding, params)
    jax.block_until_ready(y)

    # --------------- plain-JAX reference (same math, HIGHEST matmuls) --------
    def ln_ref(v, w, b, eps=LN_EPS):
        u = jnp.mean(v, -1, keepdims=True)
        sv = jnp.mean((v - u) ** 2, -1, keepdims=True)
        return w * ((v - u) / jnp.sqrt(sv + eps)) + b

    hp = jax.lax.Precision.HIGHEST
    x = gmm_embedding
    q = jnp.einsum("bsh,oh->bso", x, params["wq"], precision=hp) + params["bq"]
    scores = jnp.einsum("bqh,bkh->bqk", q, q, precision=hp) / math.sqrt(H)
    probs = jax.nn.softmax(scores, axis=-1)
    attn = jnp.einsum("bqk,bkh->bqh", probs, q, precision=hp)
    h1 = ln_ref(attn, params["ln1_w"], params["ln1_b"])
    f = jnp.einsum("bsh,oh->bso", h1, params["ffn_w1"], precision=hp) + params["ffn_b1"]
    f = jax.nn.gelu(f, approximate=True)
    f = jnp.einsum("bsh,oh->bso", f, params["ffn_w2"], precision=hp) + params["ffn_b2"]
    y_ref = ln_ref(f + h1, params["ln2_w"], params["ln2_b"])

    assert y.shape == y_ref.shape
    max_err = float(jnp.max(jnp.abs(y - y_ref)))
    assert jnp.allclose(y, y_ref, atol=1e-3, rtol=1e-3), f"max_err={max_err}"

    print("KERNEL_OK")
</pallas_src>

<mosaic_0001>
module attributes {stable_mosaic.version = 11 : i64} {
  func.func @_attn_ln1_kernel(%arg0: i32, %arg1: memref<1x8x384xf32, #tpu.memory_space<vmem>>, %arg2: memref<384x384xf32, #tpu.memory_space<vmem>>, %arg3: memref<1x384xf32, #tpu.memory_space<vmem>>, %arg4: memref<1x384xf32, #tpu.memory_space<vmem>>, %arg5: memref<1x384xf32, #tpu.memory_space<vmem>>, %arg6: memref<1x8x384xf32, #tpu.memory_space<vmem>>) attributes {dimension_semantics = [#tpu.dimension_semantics<parallel>], iteration_bounds = array<i64: 2>, scalar_prefetch = 0 : i64, scratch_operands = 0 : i64, tpu.core_type = #tpu.core_type<tc>, window_params = [{transform_indices = @transform_0, window_bounds = array<i64: 1, 8, 384>}, {pipeline_mode = #tpu.pipeline_mode<synchronous>, transform_indices = @transform_1, window_bounds = array<i64: 384, 384>}, {pipeline_mode = #tpu.pipeline_mode<synchronous>, transform_indices = @transform_2, window_bounds = array<i64: 1, 384>}, {pipeline_mode = #tpu.pipeline_mode<synchronous>, transform_indices = @transform_3, window_bounds = array<i64: 1, 384>}, {pipeline_mode = #tpu.pipeline_mode<synchronous>, transform_indices = @transform_4, window_bounds = array<i64: 1, 384>}, {transform_indices = @transform_5, window_bounds = array<i64: 1, 8, 384>}]} {
    %c0 = arith.constant 0 : index
    %c0_0 = arith.constant 0 : index
    %c0_1 = arith.constant 0 : index
    %0 = vector.load %arg1[%c0, %c0_0, %c0_1] : memref<1x8x384xf32, #tpu.memory_space<vmem>>, vector<1x8x384xf32>
    %1 = vector.shape_cast %0 : vector<1x8x384xf32> to vector<8x384xf32>
    %c0_2 = arith.constant 0 : index
    %c0_3 = arith.constant 0 : index
    %2 = vector.load %arg2[%c0_2, %c0_3] : memref<384x384xf32, #tpu.memory_space<vmem>>, vector<384x384xf32>
    %c0_4 = arith.constant 0 : index
    %c0_5 = arith.constant 0 : index
    %3 = vector.load %arg3[%c0_4, %c0_5] : memref<1x384xf32, #tpu.memory_space<vmem>>, vector<1x384xf32>
    %cst = arith.constant dense<0.000000e+00> : vector<8x384xf32>
    %4 = tpu.matmul %1, %2, %cst {dimension_numbers = #tpu.dot_dimension_numbers<[1], [0], [0], [1], [0, 0, 1, 1], [], []>} : vector<8x384xf32>, vector<384x384xf32>, vector<8x384xf32> -> vector<8x384xf32>
    %5 = vector.broadcast %3 : vector<1x384xf32> to vector<8x384xf32>
    %6 = arith.addf %4, %5 : vector<8x384xf32>
    %cst_6 = arith.constant dense<0.000000e+00> : vector<8x8xf32>
    %7 = tpu.matmul %6, %6, %cst_6 {dimension_numbers = #tpu.dot_dimension_numbers<[1], [1], [0], [0], [0, 0, 1, 0], [], []>} : vector<8x384xf32>, vector<8x384xf32>, vector<8x8xf32> -> vector<8x8xf32>
    %cst_7 = arith.constant 0.0510310382 : f32
    %8 = vector.broadcast %cst_7 : f32 to vector<8x8xf32>
    %9 = arith.mulf %7, %8 : vector<8x8xf32>
    %cst_8 = arith.constant dense<0xFF800000> : vector<8xf32>
    %10 = vector.multi_reduction <maximumf>, %9, %cst_8 [1] : vector<8x8xf32> to vector<8xf32>
    %11 = vector.shape_cast %10 : vector<8xf32> to vector<8x1xf32>
    %12 = vector.broadcast %11 : vector<8x1xf32> to vector<8x8xf32>
    %13 = arith.subf %9, %12 : vector<8x8xf32>
    %14 = math.exp %13 : vector<8x8xf32>
    %cst_9 = arith.constant dense<0.000000e+00> : vector<8xf32>
    %15 = vector.multi_reduction <add>, %14, %cst_9 [1] : vector<8x8xf32> to vector<8xf32>
    %16 = vector.shape_cast %15 : vector<8xf32> to vector<8x1xf32>
    %17 = vector.broadcast %16 : vector<8x1xf32> to vector<8x8xf32>
    %18 = arith.divf %14, %17 : vector<8x8xf32>
    %cst_10 = arith.constant dense<0.000000e+00> : vector<8x384xf32>
    %19 = tpu.matmul %18, %6, %cst_10 {dimension_numbers = #tpu.dot_dimension_numbers<[1], [0], [0], [1], [0, 0, 1, 1], [], []>} : vector<8x8xf32>, vector<8x384xf32>, vector<8x384xf32> -> vector<8x384xf32>
    %c0_11 = arith.constant 0 : index
    %c0_12 = arith.constant 0 : index
    %20 = vector.load %arg4[%c0_11, %c0_12] : memref<1x384xf32, #tpu.memory_space<vmem>>, vector<1x384xf32>
    %c0_13 = arith.constant 0 : index
    %c0_14 = arith.constant 0 : index
    %21 = vector.load %arg5[%c0_13, %c0_14] : memref<1x384xf32, #tpu.memory_space<vmem>>, vector<1x384xf32>
    %cst_15 = arith.constant dense<0.000000e+00> : vector<8xf32>
    %22 = vector.multi_reduction <add>, %19, %cst_15 [1] : vector<8x384xf32> to vector<8xf32>
    %23 = vector.shape_cast %22 : vector<8xf32> to vector<8x1xf32>
    %cst_16 = arith.constant 3.840000e+02 : f32
    %24 = vector.broadcast %cst_16 : f32 to vector<8x1xf32>
    %25 = arith.divf %23, %24 : vector<8x1xf32>
    %26 = vector.broadcast %25 : vector<8x1xf32> to vector<8x384xf32>
    %27 = arith.subf %19, %26 : vector<8x384xf32>
    %28 = arith.mulf %27, %27 : vector<8x384xf32>
    %cst_17 = arith.constant dense<0.000000e+00> : vector<8xf32>
    %29 = vector.multi_reduction <add>, %28, %cst_17 [1] : vector<8x384xf32> to vector<8xf32>
    %30 = vector.shape_cast %29 : vector<8xf32> to vector<8x1xf32>
    %cst_18 = arith.constant 3.840000e+02 : f32
    %31 = vector.broadcast %cst_18 : f32 to vector<8x1xf32>
    %32 = arith.divf %30, %31 : vector<8x1xf32>
    %cst_19 = arith.constant 9.99999996E-13 : f32
    %33 = vector.broadcast %cst_19 : f32 to vector<8x1xf32>
    %34 = arith.addf %32, %33 : vector<8x1xf32>
    %35 = math.rsqrt %34 : vector<8x1xf32>
    %36 = vector.broadcast %35 : vector<8x1xf32> to vector<8x384xf32>
    %37 = arith.mulf %27, %36 : vector<8x384xf32>
    %38 = vector.broadcast %20 : vector<1x384xf32> to vector<8x384xf32>
    %39 = arith.mulf %38, %37 : vector<8x384xf32>
    %40 = vector.broadcast %21 : vector<1x384xf32> to vector<8x384xf32>
    %41 = arith.addf %39, %40 : vector<8x384xf32>
    %c0_20 = arith.constant 0 : index
    %c0_21 = arith.constant 0 : index
    %c0_22 = arith.constant 0 : index
    %42 = vector.load %arg6[%c0_20, %c0_21, %c0_22] : memref<1x8x384xf32, #tpu.memory_space<vmem>>, vector<1x8x384xf32>
    %43 = vector.shape_cast %42 : vector<1x8x384xf32> to vector<8x384xf32>
    %44 = vector.shape_cast %41 : vector<8x384xf32> to vector<1x8x384xf32>
    tpu.vector_store %arg6[%c0_20, %c0_21, %c0_22], %44 {strides = array<i32>} : memref<1x8x384xf32, #tpu.memory_space<vmem>>, vector<1x8x384xf32>,
    return
  }
  func.func @transform_0(%arg0: i32) -> (i32, i32, i32) {
    %c0_i32 = arith.constant 0 : i32
    %c0_i32_0 = arith.constant 0 : i32
    %c0_i32_1 = arith.constant 0 : i32
    return %arg0, %c0_i32, %c0_i32_0 : i32, i32, i32
  }
  func.func @transform_1(%arg0: i32) -> (i32, i32) {
    %c0_i32 = arith.constant 0 : i32
    %c0_i32_0 = arith.constant 0 : i32
    %c0_i32_1 = arith.constant 0 : i32
    return %c0_i32, %c0_i32_0 : i32, i32
  }
  func.func @transform_2(%arg0: i32) -> (i32, i32) {
    %c0_i32 = arith.constant 0 : i32
    %c0_i32_0 = arith.constant 0 : i32
    %c0_i32_1 = arith.constant 0 : i32
    return %c0_i32, %c0_i32_0 : i32, i32
  }
  func.func @transform_3(%arg0: i32) -> (i32, i32) {
    %c0_i32 = arith.constant 0 : i32
    %c0_i32_0 = arith.constant 0 : i32
    %c0_i32_1 = arith.constant 0 : i32
    return %c0_i32, %c0_i32_0 : i32, i32
  }
  func.func @transform_4(%arg0: i32) -> (i32, i32) {
    %c0_i32 = arith.constant 0 : i32
    %c0_i32_0 = arith.constant 0 : i32
    %c0_i32_1 = arith.constant 0 : i32
    return %c0_i32, %c0_i32_0 : i32, i32
  }
  func.func @transform_5(%arg0: i32) -> (i32, i32, i32) {
    %c0_i32 = arith.constant 0 : i32
    %c0_i32_0 = arith.constant 0 : i32
    %c0_i32_1 = arith.constant 0 : i32
    return %arg0, %c0_i32, %c0_i32_0 : i32, i32, i32
  }
}

</mosaic_0001>

<bundles_post_ra>
// kernel: tpu_custom_call.1
= control target key start
LH: loop header
LB: loop body
LE: loop exit
PB: predicated region body
PF: predicated region fallthrough
CT: control target
= control target key end

     0   :  { %10 = vsyncpa [#allocation3], 0  ;;  %s1809_s0 = inlined_call_operand.hbm [shape: f32[2,8,384], index: 0, kind: input, shape index: {}]   ;;  %s1810_s1 = inlined_call_operand.hbm [shape: f32[384,384], index: 1, kind: input, shape index: {}]   ;;  %s1811_s2 = inlined_call_operand.vmem [shape: f32[1,384], index: 2, kind: input, shape index: {}]   ;;  %s1812_s3 = inlined_call_operand.hbm [shape: f32[1,384], index: 3, kind: input, shape index: {}]   ;;  %s1813_s4 = inlined_call_operand.vmem [shape: f32[1,384], index: 4, kind: input, shape index: {}]   ;;  %s1814_s5 = inlined_call_operand.hbm [shape: f32[2,8,384], index: 5, kind: output, shape index: {}]  }
   0x1   :  { %12 = vsyncpa [#allocation3 + $0x1], 0 }
   0x2   :  { %13 = vsyncpa [#allocation6], 0 }
   0x3   :  { %14 = vsyncpa [#allocation4], 0 }
   0x4   :  { %16 = vsyncpa [#allocation4 + $0x1], 0  ;;  %s1564_s18 = smov 0   ;;  %s1566_s19 = smov 0  }
   0x5   :  { %s1568_s20 = smov 0   ;;  %s1570_s21 = smov 0  }
   0x6 LB: > { %s1585_s22 = sadd.s32 4294967295, %s1524_s21   ;;  %s1180_s23 = sadd.s32 4294967294, %s1524_s21   ;;  %s1524_s21 = sphi %s1570_s21, %s1836_s21   ;;  %s1520_s20 = sphi %s1568_s20, %s1835_s20   ;;  %s1516_s19 = sphi %s1566_s19, %s1834_s19   ;;  %s1512_s18 = sphi %s1564_s18, %s1833_s18  }
   0x7   : > { %p42_p0 = scmp.ne.s32.totalorder %s1516_s19, %s1512_s18  ;;  %p1815_p1 = scmp.eq.s32.totalorder %s1585_s22, 0 }
   0x8   : > { %p156_p3 = scmp.eq.s32.totalorder %s1180_s23, 1  ;;  %p1181_p5 = scmp.ge.s32.totalorder %s1524_s21, 1 }
   0x9   : > { %p1594_p4 = por %p1815_p1, %p42_p0  ;;  %p163_p7 = scmp.lt.s32.totalorder %s1524_s21, 3 }
   0xa   : > { %p1599_p6 = por %p156_p3, %p42_p0  ;;  %s1526_s27 = smov [#allocation5]  }
   0xb   : > { %s1819_s24 = scalar_select %p1594_p4, 1, 0 }
   0xc   : > { %s1820_s25 = scalar_select %p1599_p6, 1, 0 }
   0xd   : > { %p1604_p8 = pnand %p1181_p5, %p163_p7  ;;  %s175_s28 = sshll.u32 %s1526_s27, 4  ;;  %s176_s28 = int_to_ptr.vmem [resolvable:$true] %s175_s28 }
   0xe   : > { %s1527_s30 = smov [#allocation7]   ;;  %s1387_s7 = scalar_lea.vmem %s176_s28, 18432 }
   0xf   : > { %s1821_s26 = scalar_select %p1604_p8, 1, 0 }
  0x10   : > { %p1311_p9 = pneg %p1604_p8  ;;  %s192_s6 = sshll.u32 %s1527_s30, 4  ;;  %s193_s6 = int_to_ptr.vmem [resolvable:$true] %s192_s6 }
  0x11   : > { %p1388_p13 = scmp.ne.s32.totalorder %s176_s28, %s1387_s7  ;;  %p1395_p5 = scmp.lt.s32.totalorder %s176_s28, %s176_s28 }
  0x12   : > { %p1613_p11 = pnand %p1311_p9, %p1815_p1  ;;  %p1396_p7 = scmp.lt.s32.totalorder %s1387_s7, %s1387_s7 }
  0x14   : > { %p1378_p12 = pneg %p1613_p11  ;;  %p1397_p10 = por %p1396_p7, %p1395_p5 }
  0x16   : > { %p1390_p0 = pnand %p1388_p13, %p1378_p12 }
  0x18   : > { %p1391_p3 = pneg %p1390_p0 }
  0x1a   : > { %p1398_p9 = pnand %p1397_p10, %p1391_p3 }
  0x1c   : > { %1401 = shalt.err (!%p1398_p9)
}
  0x1d   : > { %s1528_s8 = smov 384   ;;  %s1529_s9 = smov 24  }
  0x1e   : > { %1314 = dma.hbm_to_vmem [thread:$0]  (!%p1613_p11), %s1810_s1, 18432, %s176_s28, [#allocation6], %s1528_s8, %s1528_s8, %s1529_s9  }
  0x1f   : > { %s1413_s12 = scalar_lea.vmem %s193_s6, 48  ;;  %s1420_s13 = scalar_lea.vmem %s193_s6, 64 }
  0x20   : > { %p1414_p1 = scmp.ne.s32.totalorder %s193_s6, %s1413_s12  ;;  %p1421_p2 = scmp.lt.s32.totalorder %s193_s6, %s193_s6 }
  0x21   : > { %p1422_p5 = scmp.lt.s32.totalorder %s1420_s13, %s1413_s12 }
  0x22   : > { %p1416_p13 = pnand %p1414_p1, %p1378_p12 }
  0x23   : > { %p1423_p10 = por %p1422_p5, %p1421_p2 }
  0x24   : > { %p1417_p0 = pneg %p1416_p13 }
  0x26   : > { %p1424_p3 = pnand %p1423_p10, %p1417_p0 }
  0x28   : > { %1427 = shalt.err (!%p1424_p3)
}
  0x29   : > { %1317 = dma.hbm_to_vmem [thread:$0]  (!%p1613_p11), %s1812_s3, 48, %s193_s6, [#allocation6]  }
  0x2a   : > { %s1636_s16 = sadd.s32 1, %s1524_s21   ;;  %s29_s17 = sadd.s32 1, %s1520_s20 }
  0x2b   : > { %s26_s23 = ssub.s32 %s1524_s21, %s1636_s16  ;;  %p36_p1 = scmp.ne.s32.totalorder %s1520_s20, %s1516_s19 }
  0x2c   : > { %p27_p2 = scmp.eq.s32.totalorder %s26_s23, 0  ;;  %p37_p12 = scmp.eq.s32.totalorder %s1524_s21, 0 }
  0x2d   : > { %p1823_p7 = scmp.eq.s32.totalorder %s1585_s22, 1  ;;  %p1328_p13 = scmp.lt.s32.totalorder %s1524_s21, 2 }
  0x2e   : > { %s1652_s28 = scalar_select %p27_p2, %s1520_s20, %s29_s17  }
  0x2f   : > { %p1646_p9 = por %p1823_p7, %p36_p1  ;;  %p38_p0 = por %p37_p12, %p36_p1 }
  0x30   : > { %s206_s29 = sand.u32 1, %s1520_s20   ;;  %s1296_s6 = smul.u32 384, %s1524_s21 }
  0x31   : > { %s1824_s27 = scalar_select %p1646_p9, 1, 0 }
  0x32   : > { %s1295_s30 = smul.u32 24, %s206_s29  ;;  %p1656_p11 = pnand %p1328_p13, %p38_p0 }
  0x33   : > { %s1663_s10 = scalar_lea.hbm %s1809_s0, %s1296_s6  ;;  %s207_s13 = scalar_lea.sflag [#allocation3], %s206_s29 }
  0x34   : > { %s210_s11 = scalar_lea.vmem [#allocation2], %s1295_s30  ;;  %s1428_s14 = scalar_lea.hbm %s1663_s10, 384 }
  0x35   : > { %s218_s12 = sshll.u32 %s210_s11, 4  ;;  %p1429_p5 = scmp.ne.s32.totalorder %s1663_s10, %s1428_s14  ;;  %s219_s12 = int_to_ptr.vmem [resolvable:$true] %s218_s12 }
  0x36   : > { %p1430_p10 = pneg %p1656_p11  ;;  %s1433_s23 = scalar_lea.hbm %s1809_s0, 768 }
  0x37   : > { %p1434_p2 = scmp.lt.s32.totalorder %s1663_s10, %s1809_s0  ;;  %p1435_p12 = scmp.lt.s32.totalorder %s1433_s23, %s1428_s14 }
  0x38   : > { %p1431_p3 = pnand %p1430_p10, %p1429_p5 }
  0x39   : > { %p1436_p7 = por %p1435_p12, %p1434_p2 }
  0x3a   : > { %p1432_p1 = pneg %p1431_p3 }
  0x3c   : > { %p1437_p13 = pnand %p1436_p7, %p1432_p1 }
  0x3e   : > { %1440 = shalt.err (!%p1437_p13)
}
  0x3f   : > { %s1441_s30 = scalar_lea.vmem %s219_s12, 384  ;;  %s1530_s29 = smov [#allocation2]  }
  0x40   : > { %p1442_p0 = scmp.ne.s32.totalorder %s219_s12, %s1441_s30  ;;  %s1446_s9 = sshll.u32 %s1530_s29, 4  ;;  %s1447_s9 = int_to_ptr.vmem [resolvable:$false] %s1446_s9 }
  0x41   : > { %s1448_s11 = scalar_lea.vmem %s1447_s9, 768  ;;  %p1449_p5 = scmp.lt.s32.totalorder %s219_s12, %s1447_s9 }
  0x42   : > { %p1444_p6 = pnand %p1442_p0, %p1430_p10  ;;  %p1450_p3 = scmp.lt.s32.totalorder %s1448_s11, %s1441_s30 }
  0x44   : > { %p1445_p9 = pneg %p1444_p6  ;;  %p1451_p4 = por %p1450_p3, %p1449_p5 }
  0x46   : > { %p1452_p8 = pnand %p1451_p4, %p1445_p9 }
  0x48   : > { %1455 = shalt.err (!%p1452_p8)
}
  0x49   : > { %1321 = dma.hbm_to_vmem [thread:$0]  (!%p1656_p11), %s1663_s10, 384, %s219_s12, %s207_s13  }
  0x4a   : > { %p1826_p1 = scmp.ne.s32.totalorder %s1821_s26, 0 }
  0x4b   : > { %s1682_s14 = sand.u32 (!%p1826_p1), 1, %s1516_s19   ;;  %p1827_p4 = scmp.ne.s32.totalorder (!%p1826_p1), %s1819_s24, 0 }
  0x4c   : > { %227 = sbr.rel (%p1826_p1) target bundleno = 1412 (0x584), region = 40  ;;  %s230_s17 = scalar_lea.sflag (!%p1826_p1), [#allocation3], %s1682_s14 }
  0x4d   : > { %s1297_s15 = smul.u32 (!%p1826_p1), 24, %s1682_s14 }
  0x4f   : > { %s1688_s23 = scalar_lea.vmem (!%p1826_p1), [#allocation2], %s1297_s15 }
  0x51   : > { %1499 = dma.done.wait (%p1827_p4), %s230_s17, 384  }
  0x52   : > { %1501 = vsyncadd (%p1827_p4), %s230_s17, 4294966912  ;;  %p1828_p6 = scmp.eq.s32.totalorder %s1585_s22, 0 }
  0x54   : > { %1503 = dma.done.wait (%p1828_p6), [#allocation6], 18480   ;;  %p1829_p8 = pmov %p1828_p6 }
  0x55   : > { %v1531_v0 = vmov 0.0   ;;  %v317_v1 = vld [vmem:[#allocation5 + $0x170] sm:$0xff]  ;;  %v316_v2 = vld [vmem:[#allocation5 + $0x168] sm:$0xff]  ;;  %v314_v3 = vld [vmem:[#allocation5 + $0x158] sm:$0xff]  ;;  %vm1532_vm0 = vmmov 0   ;;  %vm855_vm1 = vcmask 64512  }
  0x56   : > { %1505 = vsyncadd (%p1829_p8), [#allocation6], 4294948816  ;;  %567 = vmatprep.mubr.f32.mxu1 %v1531_v0  ;;  %432 = vmatprep.subr.mxu0 %v317_v1  ;;  %v313_v4 = vld [vmem:[#allocation5 + $0x150] sm:$0xff]  ;;  %v311_v5 = vld [vmem:[#allocation5 + $0x140] sm:$0xff]  ;;  %s1298_s12 = smul.u32 384, %s1585_s22  ;;  %s267_s13 = scalar_lea.vmem [#allocation8], %s1297_s15 }
  0x57   : > { %433 = vmatpush1.msra.mxu0 %v316_v2  ;;  %v310_v6 = vld [vmem:[#allocation5 + $0x138] sm:$0xff]  ;;  %v308_v7 = vld [vmem:[#allocation5 + $0x128] sm:$0xff]  ;;  %v307_v8 = vld [vmem:[#allocation5 + $0x120] sm:$0xff]  ;;  %s1091_s8 = sshll.u32 %s267_s13, 4  ;;  %s1077_s22 = scalar_lea.sflag [#allocation4], %s1682_s14  ;;  %s1768_s8 = int_to_ptr.vmem [resolvable:$true] %s1091_s8 }
  0x58   : > { %434 = vmatprep.subr.mxu0 %v314_v3  ;;  %v305_v9 = vld [vmem:[#allocation5 + $0x110] sm:$0xff]  ;;  %v304_v10 = vld [vmem:[#allocation5 + $0x108] sm:$0xff]  ;;  %v302_v11 = vld [vmem:[#allocation5 + $0xf8] sm:$0xff]  ;;  %s1766_s29 = scalar_lea.hbm %s1814_s5, %s1298_s12  ;;  %s1456_s9 = scalar_lea.vmem %s1768_s8, 384 }
  0x59   : > { %435 = vmatpush1.msra.mxu0 %v313_v4  ;;  %v413_v12 = vld [vmem:[#allocation5 + $0x470] sm:$0xff]  ;;  %v412_v14 = vld [vmem:[#allocation5 + $0x468] sm:$0xff]  ;;  %v410_v15 = vld [vmem:[#allocation5 + $0x458] sm:$0xff]  ;;  %p1457_p9 = scmp.ne.s32.totalorder %s1768_s8, %s1456_s9  ;;  %p1830_p11 = scmp.ne.s32.totalorder %s1824_s27, 0 }
  0x5a   : > { %436 = vmatprep.subr.mxu0 %v311_v5  ;;  %v301_v13 = vld [vmem:[#allocation5 + $0xf0] sm:$0xff]  ;;  %503 = vmatprep.subr.mxu1 %v413_v12  ;;  %v299_v16 = vld [vmem:[#allocation5 + $0xe0] sm:$0xff]  ;;  %v298_v18 = vld [vmem:[#allocation5 + $0xd8] sm:$0xff]  ;;  %s1533_s11 = smov [#allocation8]  }
  0x5b   : > { %437 = vmatpush1.msra.mxu0 %v310_v6  ;;  %504 = vmatpush1.msra.mxu1 %v412_v14  ;;  %v409_v17 = vld [vmem:[#allocation5 + $0x450] sm:$0xff]  ;;  %v407_v19 = vld [vmem:[#allocation5 + $0x440] sm:$0xff]  ;;  %v406_v20 = vld [vmem:[#allocation5 + $0x438] sm:$0xff]  ;;  %p1458_p10 = pnand %p1457_p9, %p1830_p11  ;;  %s1460_s15 = sshll.u32 %s1533_s11, 4  ;;  %s1461_s15 = int_to_ptr.vmem [resolvable:$false] %s1460_s15 }
  0x5c   : > { %438 = vmatprep.subr.mxu0 %v308_v7  ;;  %505 = vmatprep.subr.mxu1 %v410_v15  ;;  %v296_v21 = vld [vmem:[#allocation5 + $0xc8] sm:$0xff]  ;;  %v295_v23 = vld [vmem:[#allocation5 + $0xc0] sm:$0xff]  ;;  %v293_v25 = vld [vmem:[#allocation5 + $0xb0] sm:$0xff]  ;;  %s1462_s17 = scalar_lea.vmem %s1461_s15, 768  ;;  %p1463_p12 = scmp.lt.s32.totalorder %s1768_s8, %s1461_s15 }
  0x5d   : > { %439 = vmatpush1.msra.mxu0 %v307_v8  ;;  %506 = vmatpush1.msra.mxu1 %v409_v17  ;;  %v404_v22 = vld [vmem:[#allocation5 + $0x428] sm:$0xff]  ;;  %v403_v24 = vld [vmem:[#allocation5 + $0x420] sm:$0xff]  ;;  %v401_v26 = vld [vmem:[#allocation5 + $0x410] sm:$0xff]  ;;  %p1459_p2 = pneg %p1458_p10  ;;  %p1464_p7 = scmp.lt.s32.totalorder %s1462_s17, %s1456_s9 }
  0x5e   : > { %440 = vmatprep.subr.mxu0 %v305_v9  ;;  %507 = vmatprep.subr.mxu1 %v407_v19  ;;  %v292_v27 = vld [vmem:[#allocation5 + $0xa8] sm:$0xff]  ;;  %v290_v29 = vld [vmem:[#allocation5 + $0x98] sm:$0xff]  ;;  %v289_v31 = vld [vmem:[#allocation5 + $0x90] sm:$0xff] }
  0x5f   : > { %441 = vmatpush1.msra.mxu0 %v304_v10  ;;  %508 = vmatpush1.msra.mxu1 %v406_v20  ;;  %v400_v28 = vld [vmem:[#allocation5 + $0x408] sm:$0xff]  ;;  %v398_v30 = vld [vmem:[#allocation5 + $0x3f8] sm:$0xff]  ;;  %v397_v32 = vld [vmem:[#allocation5 + $0x3f0] sm:$0xff]  ;;  %p1465_p13 = por %p1464_p7, %p1463_p12 }
  0x60   : > { %442 = vmatprep.subr.mxu0 %v302_v11  ;;  %509 = vmatprep.subr.mxu1 %v404_v22  ;;  %v287_v33 = vld [vmem:[#allocation5 + $0x80] sm:$0xff]  ;;  %v286_v35 = vld [vmem:[#allocation5 + $0x78] sm:$0xff]  ;;  %v284_v37 = vld [vmem:[#allocation5 + $0x68] sm:$0xff] }
  0x61   : > { %443 = vmatpush1.msra.mxu0 %v301_v13  ;;  %510 = vmatpush1.msra.mxu1 %v403_v24  ;;  %v395_v34 = vld [vmem:[#allocation5 + $0x3e0] sm:$0xff]  ;;  %v394_v36 = vld [vmem:[#allocation5 + $0x3d8] sm:$0xff]  ;;  %v392_v38 = vld [vmem:[#allocation5 + $0x3c8] sm:$0xff]  ;;  %p1466_p0 = pnand %p1465_p13, %p1459_p2 }
  0x62   : > { %444 = vmatprep.subr.mxu0 %v299_v16  ;;  %511 = vmatprep.subr.mxu1 %v401_v26  ;;  %v283_v39 = vld [vmem:[#allocation5 + $0x60] sm:$0xff]  ;;  %v281_v41 = vld [vmem:[#allocation5 + $0x50] sm:$0xff]  ;;  %v280_v43 = vld [vmem:[#allocation5 + $0x48] sm:$0xff] }
  0x63   : > { %445 = vmatpush1.msra.mxu0 %v298_v18  ;;  %512 = vmatpush1.msra.mxu1 %v400_v28  ;;  %v391_v40 = vld [vmem:[#allocation5 + $0x3c0] sm:$0xff]  ;;  %v389_v42 = vld [vmem:[#allocation5 + $0x3b0] sm:$0xff]  ;;  %v388_v44 = vld [vmem:[#allocation5 + $0x3a8] sm:$0xff] }
  0x64   : > { %446 = vmatprep.subr.mxu0 %v296_v21  ;;  %513 = vmatprep.subr.mxu1 %v398_v30  ;;  %v278_v45 = vld [vmem:[#allocation5 + $0x38] sm:$0xff]  ;;  %v277_v47 = vld [vmem:[#allocation5 + $0x30] sm:$0xff]  ;;  %v275_v49 = vld [vmem:[#allocation5 + $0x20] sm:$0xff] }
  0x65   : > { %447 = vmatpush1.msra.mxu0 %v295_v23  ;;  %514 = vmatpush1.msra.mxu1 %v397_v32  ;;  %v386_v46 = vld [vmem:[#allocation5 + $0x398] sm:$0xff]  ;;  %v385_v48 = vld [vmem:[#allocation5 + $0x390] sm:$0xff]  ;;  %v383_v50 = vld [vmem:[#allocation5 + $0x380] sm:$0xff] }
  0x66   : > { %448 = vmatprep.subr.mxu0 %v293_v25  ;;  %515 = vmatprep.subr.mxu1 %v395_v34  ;;  %v274_v51 = vld [vmem:[#allocation5 + $0x18] sm:$0xff]  ;;  %v272_v53 = vld [vmem:[#allocation5 + $0x8] sm:$0xff]  ;;  %v271_v55 = vld [vmem:[#allocation5] sm:$0xff] }
  0x67   : > { %449 = vmatpush1.msra.mxu0 %v292_v27  ;;  %516 = vmatpush1.msra.mxu1 %v394_v36  ;;  %v382_v52 = vld [vmem:[#allocation5 + $0x378] sm:$0xff]  ;;  %v380_v54 = vld [vmem:[#allocation5 + $0x368] sm:$0xff]  ;;  %v379_v56 = vld [vmem:[#allocation5 + $0x360] sm:$0xff] }
  0x68   : > { %450 = vmatprep.subr.mxu0 %v290_v29  ;;  %517 = vmatprep.subr.mxu1 %v392_v38  ;;  %v365_v57 = vld [vmem:[#allocation5 + $0x2f0] sm:$0xff]  ;;  %v364_v59 = vld [vmem:[#allocation5 + $0x2e8] sm:$0xff]  ;;  %v362_v61 = vld [vmem:[#allocation5 + $0x2d8] sm:$0xff] }
  0x69   : > { %451 = vmatpush1.msra.mxu0 %v289_v31  ;;  %518 = vmatpush1.msra.mxu1 %v391_v40  ;;  %v377_v58 = vld [vmem:[#allocation5 + $0x350] sm:$0xff]  ;;  %v376_v60 = vld [vmem:[#allocation5 + $0x348] sm:$0xff]  ;;  %v374_v62 = vld [vmem:[#allocation5 + $0x338] sm:$0xff] }
  0x6a   : > { %452 = vmatprep.subr.mxu0 %v287_v33  ;;  %519 = vmatprep.subr.mxu1 %v389_v42  ;;  %v361_v63 = vld [vmem:[#allocation5 + $0x2d0] sm:$0xff]  ;;  %v359_v2 = vld [vmem:[#allocation5 + $0x2c0] sm:$0xff]  ;;  %v358_v4 = vld [vmem:[#allocation5 + $0x2b8] sm:$0xff] }
  0x6b   : > { %453 = vmatpush1.msra.mxu0 %v286_v35  ;;  %520 = vmatpush1.msra.mxu1 %v388_v44  ;;  %v373_v1 = vld [vmem:[#allocation5 + $0x330] sm:$0xff]  ;;  %v371_v3 = vld [vmem:[#allocation5 + $0x320] sm:$0xff]  ;;  %v370_v5 = vld [vmem:[#allocation5 + $0x318] sm:$0xff] }
  0x6c   : > { %454 = vmatprep.subr.mxu0 %v284_v37  ;;  %521 = vmatprep.subr.mxu1 %v386_v46  ;;  %v356_v6 = vld [vmem:[#allocation5 + $0x2a8] sm:$0xff]  ;;  %v355_v8 = vld [vmem:[#allocation5 + $0x2a0] sm:$0xff]  ;;  %v353_v10 = vld [vmem:[#allocation5 + $0x290] sm:$0xff] }
  0x6d   : > { %455 = vmatpush1.msra.mxu0 %v283_v39  ;;  %522 = vmatpush1.msra.mxu1 %v385_v48  ;;  %v368_v7 = vld [vmem:[#allocation5 + $0x308] sm:$0xff]  ;;  %v367_v9 = vld [vmem:[#allocation5 + $0x300] sm:$0xff]  ;;  %v366_v11 = vld [vmem:[#allocation5 + $0x2f8] sm:$0xff] }
  0x6e   : > { %456 = vmatprep.subr.mxu0 %v281_v41  ;;  %523 = vmatprep.subr.mxu1 %v383_v50  ;;  %v352_v12 = vld [vmem:[#allocation5 + $0x288] sm:$0xff]  ;;  %v1700_v13 = vld [vmem:[%s1688_s23 + $0x10] sm:$0xff]  ;;  %v349_v16 = vld [vmem:[#allocation5 + $0x270] sm:$0xff] }
  0x6f   : > { %457 = vmatpush1.msra.mxu0 %v280_v43  ;;  %524 = vmatpush1.msra.mxu1 %v382_v52  ;;  %v350_v14 = vld [vmem:[#allocation5 + $0x278] sm:$0xff]  ;;  %v363_v17 = vld [vmem:[#allocation5 + $0x2e0] sm:$0xff]  ;;  %v360_v21 = vld [vmem:[#allocation5 + $0x2c8] sm:$0xff] }
  0x70   : > { %458 = vmatprep.subr.mxu0 %v278_v45  ;;  %525 = vmatprep.subr.mxu1 %v380_v54  ;;  %v318_v15 = vld [vmem:[#allocation5 + $0x178] sm:$0xff]  ;;  %v347_v18 = vld [vmem:[#allocation5 + $0x260] sm:$0xff]  ;;  %v344_v22 = vld [vmem:[#allocation5 + $0x248] sm:$0xff] }
  0x71   : > { %459 = vmatpush1.msra.mxu0 %v277_v47  ;;  %526 = vmatpush1.msra.mxu1 %v379_v56  ;;  %v315_v19 = vld [vmem:[#allocation5 + $0x160] sm:$0xff]  ;;  %v346_v20 = vld [vmem:[#allocation5 + $0x258] sm:$0xff]  ;;  %v312_v23 = vld [vmem:[#allocation5 + $0x148] sm:$0xff] }
  0x72   : > { %460 = vmatprep.subr.mxu0 %v275_v49  ;;  %527 = vmatprep.subr.mxu1 %v377_v58  ;;  %v343_v24 = vld [vmem:[#allocation5 + $0x240] sm:$0xff]  ;;  %v357_v25 = vld [vmem:[#allocation5 + $0x2b0] sm:$0xff]  ;;  %v340_v28 = vld [vmem:[#allocation5 + $0x228] sm:$0xff] }
  0x73   : > { %461 = vmatpush1.msra.mxu0 %v274_v51  ;;  %528 = vmatpush1.msra.mxu1 %v376_v60  ;;  %v341_v26 = vld [vmem:[#allocation5 + $0x230] sm:$0xff]  ;;  %v338_v30 = vld [vmem:[#allocation5 + $0x218] sm:$0xff]  ;;  %v335_v34 = vld [vmem:[#allocation5 + $0x200] sm:$0xff] }
  0x74   : > { %462 = vmatprep.subr.mxu0 %v272_v53  ;;  %529 = vmatprep.subr.mxu1 %v374_v62  ;;  %v1704_v27 = vld [vmem:[%s1688_s23 + $0x8] sm:$0xff]  ;;  %v351_v35 = vld [vmem:[#allocation5 + $0x280] sm:$0xff]  ;;  %v332_v38 = vld [vmem:[#allocation5 + $0x1e8] sm:$0xff] }
  0x75   : > { %463 = vmatpush1.msra.mxu0 %v271_v55  ;;  %530 = vmatpush1.msra.mxu1 %v373_v1  ;;  %v309_v29 = vld [vmem:[#allocation5 + $0x130] sm:$0xff]  ;;  %v354_v31 = vld [vmem:[#allocation5 + $0x298] sm:$0xff]  ;;  %v303_v37 = vld [vmem:[#allocation5 + $0x100] sm:$0xff] }
  0x76   : > { %464 = vmatprep.subr.mxu0 %v365_v57  ;;  %531 = vmatprep.subr.mxu1 %v371_v3  ;;  %v337_v32 = vld [vmem:[#allocation5 + $0x210] sm:$0xff]  ;;  %v306_v33 = vld [vmem:[#allocation5 + $0x118] sm:$0xff]  ;;  %v348_v39 = vld [vmem:[#allocation5 + $0x268] sm:$0xff] }
  0x77   : > { %465 = vmatpush2.msra.mxu0 %v364_v59  ;;  %532 = vmatpush1.msra.mxu1 %v370_v5  ;;  %v334_v36 = vld [vmem:[#allocation5 + $0x1f8] sm:$0xff]  ;;  %v331_v40 = vld [vmem:[#allocation5 + $0x1e0] sm:$0xff]  ;;  %v300_v41 = vld [vmem:[#allocation5 + $0xe8] sm:$0xff] }
  0x78   : > { %466 = vmatprep.subr.mxu0 %v362_v61  ;;  %533 = vmatprep.subr.mxu1 %v368_v7  ;;  %v329_v42 = vld [vmem:[#allocation5 + $0x1d0] sm:$0xff]  ;;  %v328_v44 = vld [vmem:[#allocation5 + $0x1c8] sm:$0xff]  ;;  %v326_v46 = vld [vmem:[#allocation5 + $0x1b8] sm:$0xff] }
  0x79   : > { %467 = vmatpush2.msra.mxu0 %v361_v63  ;;  %534 = vmatpush1.msra.mxu1 %v367_v9  ;;  %v345_v43 = vld [vmem:[#allocation5 + $0x250] sm:$0xff]  ;;  %v342_v47 = vld [vmem:[#allocation5 + $0x238] sm:$0xff]  ;;  %v323_v50 = vld [vmem:[#allocation5 + $0x1a0] sm:$0xff] }
  0x7a   : > { %468 = vmatprep.subr.mxu0 %v359_v2  ;;  %1194 = vmatprep.subr.mxu1 %v366_v11  ;;  %v297_v45 = vld [vmem:[#allocation5 + $0xd0] sm:$0xff]  ;;  %v294_v49 = vld [vmem:[#allocation5 + $0xb8] sm:$0xff]  ;;  %v339_v51 = vld [vmem:[#allocation5 + $0x220] sm:$0xff] }
  0x7b   : > { %469 = vmatpush2.msra.mxu0 %v358_v4  ;;  %568 = vmatmul.mubr.f32.vlgmr.msra.gmra.mxu1 %v1700_v13  ;;  %v325_v48 = vld [vmem:[#allocation5 + $0x1b0] sm:$0xff]  ;;  %v322_v52 = vld [vmem:[#allocation5 + $0x198] sm:$0xff]  ;;  %v291_v53 = vld [vmem:[#allocation5 + $0xa0] sm:$0xff] }
  0x7c   : > { %470 = vmatprep.subr.mxu0 %v356_v6  ;;  %1195 = vmatpush3.msra.mxu1 %v318_v15  ;;  %v320_v54 = vld [vmem:[#allocation5 + $0x188] sm:$0xff]  ;;  %v319_v56 = vld [vmem:[#allocation5 + $0x180] sm:$0xff]  ;;  %v414_v59 = vld [vmem:[#allocation5 + $0x478] sm:$0xff] }
  0x7d   : > { %471 = vmatpush2.msra.mxu0 %v355_v8  ;;  %1196 = vmatprep.subr.mxu1 %v363_v17  ;;  %v336_v55 = vld [vmem:[#allocation5 + $0x208] sm:$0xff]  ;;  %v333_v60 = vld [vmem:[#allocation5 + $0x1f0] sm:$0xff]  ;;  %v411_v62 = vld [vmem:[#allocation5 + $0x460] sm:$0xff] }
  0x7e   : > { %472 = vmatprep.subr.mxu0 %v353_v10  ;;  %1197 = vmatpush3.msra.mxu1 %v315_v19  ;;  %v288_v57 = vld [vmem:[#allocation5 + $0x88] sm:$0xff]  ;;  %v285_v61 = vld [vmem:[#allocation5 + $0x70] sm:$0xff]  ;;  %v330_v63 = vld [vmem:[#allocation5 + $0x1d8] sm:$0xff] }
  0x7f   : > { %473 = vmatpush2.msra.mxu0 %v352_v12  ;;  %1198 = vmatprep.subr.mxu1 %v360_v21  ;;  %v268_v58 = vld [vmem:[%s1688_s23] sm:$0xff]  ;;  %v282_v1 = vld [vmem:[#allocation5 + $0x58] sm:$0xff]  ;;  %v327_v3 = vld [vmem:[#allocation5 + $0x1c0] sm:$0xff] }
  0x80   : > { %474 = vmatprep.subr.mxu0 %v350_v14  ;;  %1199 = vmatpush3.msra.mxu1 %v312_v23  ;;  %v408_v2 = vld [vmem:[#allocation5 + $0x448] sm:$0xff]  ;;  %v279_v4 = vld [vmem:[#allocation5 + $0x40] sm:$0xff]  ;;  %v405_v5 = vld [vmem:[#allocation5 + $0x430] sm:$0xff]  ;;  %v417_v23 = vlaneseq }
  0x81   : > { %475 = vmatpush2.msra.mxu0 %v349_v16  ;;  %1200 = vmatprep.subr.mxu1 %v357_v25  ;;  %v324_v6 = vld [vmem:[#allocation5 + $0x1a8] sm:$0xff]  ;;  %v402_v8 = vld [vmem:[#allocation5 + $0x418] sm:$0xff]  ;;  %v321_v9 = vld [vmem:[#allocation5 + $0x190] sm:$0xff] }
  0x82   : > { %476 = vmatprep.subr.mxu0 %v347_v18  ;;  %496 = vmatprep.mubr.f32.mxu0 %v1704_v27  ;;  %v276_v7 = vld [vmem:[#allocation5 + $0x28] sm:$0xff]  ;;  %v273_v10 = vld [vmem:[#allocation5 + $0x10] sm:$0xff]  ;;  %v399_v11 = vld [vmem:[#allocation5 + $0x400] sm:$0xff] }
  0x83   : > { %477 = vmatpush2.msra.mxu0 %v346_v20  ;;  %1201 = vmatpush3.msra.mxu1 %v309_v29  ;;  %v396_v12 = vld [vmem:[#allocation5 + $0x3e8] sm:$0xff]  ;;  %v393_v14 = vld [vmem:[#allocation5 + $0x3d0] sm:$0xff]  ;;  %v390_v15 = vld [vmem:[#allocation5 + $0x3b8] sm:$0xff] }
  0x84   : > { %478 = vmatprep.subr.mxu0 %v344_v22  ;;  %1202 = vmatprep.subr.mxu1 %v354_v31  ;;  %v387_v16 = vld [vmem:[#allocation5 + $0x3a0] sm:$0xff]  ;;  %v384_v17 = vld [vmem:[#allocation5 + $0x388] sm:$0xff]  ;;  %v381_v18 = vld [vmem:[#allocation5 + $0x370] sm:$0xff] }
  0x85   : > { %479 = vmatpush2.msra.mxu0 %v343_v24  ;;  %1203 = vmatpush3.msra.mxu1 %v306_v33  ;;  %v378_v19 = vld [vmem:[#allocation5 + $0x358] sm:$0xff]  ;;  %v375_v20 = vld [vmem:[#allocation5 + $0x340] sm:$0xff]  ;;  %v372_v21 = vld [vmem:[#allocation5 + $0x328] sm:$0xff]  ;;  %v418_v24 = vshrl.u32 %v417_v23, 7 }
  0x86   : > { %480 = vmatprep.subr.mxu0 %v341_v26  ;;  %1204 = vmatprep.subr.mxu1 %v351_v35  ;;  %v369_v22 = vld [vmem:[#allocation5 + $0x310] sm:$0xff] }
  0x87   : > { %481 = vmatpush2.msra.mxu0 %v340_v28  ;;  %1205 = vmatpush3.msra.mxu1 %v303_v37  ;;  %v1728_v25 = vsub.s32 0, %v418_v24  ;;  %v415_v26 = vld [vmem:[%s1811_s2] sm:$0x7] }
  0x88   : > { %482 = vmatprep.subr.mxu0 %v338_v30  ;;  %1206 = vmatprep.subr.mxu1 %v348_v39 }
  0x89   : > { %483 = vmatpush2.msra.mxu0 %v337_v32  ;;  %1207 = vmatpush3.msra.mxu1 %v300_v41  ;;  %v420_v28 = vrot.slane %v415_v26, %v1728_v25 }
  0x8a   : > { %484 = vmatprep.subr.mxu0 %v335_v34  ;;  %1208 = vmatprep.subr.mxu1 %v345_v43 }
  0x8b   : > { %485 = vmatpush2.msra.mxu0 %v334_v36  ;;  %1209 = vmatpush3.msra.mxu1 %v297_v45 }
  0x8c   : > { %486 = vmatprep.subr.mxu0 %v332_v38  ;;  %1210 = vmatprep.subr.mxu1 %v342_v47  ;;  %v1740_v38 = vsub.s32 2, %v418_v24 }
  0x8d   : > { %487 = vmatpush2.msra.mxu0 %v331_v40  ;;  %1211 = vmatpush3.msra.mxu1 %v294_v49 }
  0x8e   : > { %488 = vmatprep.subr.mxu0 %v329_v42  ;;  %1212 = vmatprep.subr.mxu1 %v339_v51  ;;  %v428_v41 = vrot.slane %v415_v26, %v1740_v38 }
  0x8f   : > { %489 = vmatpush2.msra.mxu0 %v328_v44  ;;  %1213 = vmatpush3.msra.mxu1 %v291_v53 }
  0x90   : > { %490 = vmatprep.subr.mxu0 %v326_v46  ;;  %1214 = vmatprep.subr.mxu1 %v336_v55 }
  0x91   : > { %491 = vmatpush2.msra.mxu0 %v325_v48  ;;  %1215 = vmatpush3.msra.mxu1 %v288_v57 }
  0x92   : > { %492 = vmatprep.subr.mxu0 %v323_v50  ;;  %1216 = vmatprep.subr.mxu1 %v333_v60 }
  0x93   : > { %493 = vmatpush2.msra.mxu0 %v322_v52  ;;  %1217 = vmatpush3.msra.mxu1 %v285_v61 }
  0x94   : > { %494 = vmatprep.subr.mxu0 %v320_v54  ;;  %1218 = vmatprep.subr.mxu1 %v330_v63 }
  0x95   : > { %495 = vmatpush2.msra.mxu0 %v319_v56  ;;  %1219 = vmatpush3.msra.mxu1 %v282_v1 }
  0x96   : > { %497 = vmatmul.mubr.f32.vlgmr.msra.gmra.mxu0 %v268_v58  ;;  %1250 = vmatprep.subr.mxu0 %v1531_v0 }
  0x97   : > { %1251 = vmatpush3.msra.mxu0 %v414_v59  ;;  %1220 = vmatprep.subr.mxu1 %v327_v3 }
  0x98   : > { %1252 = vmatprep.subr.mxu0 %v1531_v0  ;;  %1221 = vmatpush3.msra.mxu1 %v279_v4 }
  0x99   : > { %1253 = vmatpush3.msra.mxu0 %v411_v62  ;;  %1222 = vmatprep.subr.mxu1 %v324_v6 }
  0x9a   : > { %1254 = vmatprep.subr.mxu0 %v1531_v0  ;;  %1223 = vmatpush3.msra.mxu1 %v276_v7 }
  0x9b   : > { %1255 = vmatpush3.msra.mxu0 %v408_v2  ;;  %1224 = vmatprep.subr.mxu1 %v321_v9 }
  0x9c   : > { %1256 = vmatprep.subr.mxu0 %v1531_v0  ;;  %1225 = vmatpush3.msra.mxu1 %v273_v10 }
  0x9d   : > { %1257 = vmatpush3.msra.mxu0 %v405_v5  ;;  %638 = vmatprep.mubr.f32.mxu1 %v1704_v27  ;;  %v1733_v27 = vsub.s32 1, %v418_v24 }
  0x9e   : > { %1258 = vmatprep.subr.mxu0 %v1531_v0  ;;  %639 = vmatmul.mubr.f32.vlgmr.msra.gmra.mxu1 %v268_v58 }
  0x9f   : > { %1259 = vmatpush3.msra.mxu0 %v402_v8  ;;  %1282 = vmatprep.mubr.msk.f32.mxu0 %vm1532_vm0, %v1531_v0  ;;  %v424_v29 = vrot.slane %v415_v26, %v1733_v27 }
  0xa0   : > { %1260 = vmatprep.subr.mxu0 %v1531_v0 }
  0xa1   : > { %1261 = vmatpush3.msra.mxu0 %v399_v11 }
  0xa2   : > { %1262 = vmatprep.subr.mxu0 %v1531_v0 }
  0xa3   : > { %1263 = vmatpush3.msra.mxu0 %v396_v12 }
  0xa4   : > { %1264 = vmatprep.subr.mxu0 %v1531_v0 }
  0xa5   : > { %1265 = vmatpush3.msra.mxu0 %v393_v14 }
  0xa6   : > { %1266 = vmatprep.subr.mxu0 %v1531_v0 }
  0xa7   : > { %1267 = vmatpush3.msra.mxu0 %v390_v15 }
  0xa8   : > { %1268 = vmatprep.subr.mxu0 %v1531_v0 }
  0xa9   : > { %1269 = vmatpush3.msra.mxu0 %v387_v16 }
  0xaa   : > { %1270 = vmatprep.subr.mxu0 %v1531_v0 }
  0xab   : > { %1271 = vmatpush3.msra.mxu0 %v384_v17  ;;  %v1011_v17 = vld [vmem:[#allocation7] sm:$0x7] }
  0xac   : > { %1272 = vmatprep.subr.mxu0 %v1531_v0 }
  0xad   : > { %1273 = vmatpush3.msra.mxu0 %v381_v18  ;;  %v1012_v18 = vld [vmem:[%s1813_s4] sm:$0x7] }
  0xae   : > { %1274 = vmatprep.subr.mxu0 %v1531_v0  ;;  %v1058_v23 = vrot.slane %v1012_v18, %v1728_v25  ;;  %v1062_v24 = vrot.slane %v1012_v18, %v1733_v27  ;;  %v1066_v26 = vrot.slane %v1012_v18, %v1740_v38 }
  0xaf   : > { %1275 = vmatpush3.msra.mxu0 %v378_v19  ;;  %v1039_v19 = vrot.slane %v1011_v17, %v1728_v25 }
  0xb0   : > { %1276 = vmatprep.subr.mxu0 %v1531_v0 }
  0xb1   : > { %1277 = vmatpush3.msra.mxu0 %v375_v20  ;;  %v1043_v20 = vrot.slane %v1011_v17, %v1733_v27 }
  0xb2   : > { %1278 = vmatprep.subr.mxu0 %v1531_v0 }
  0xb3   : > { %1279 = vmatpush3.msra.mxu0 %v372_v21  ;;  %v1047_v21 = vrot.slane %v1011_v17, %v1740_v38 }
  0xb4   : > { %1280 = vmatprep.subr.mxu0 %v1531_v0 }
  0xb5   : > { %1281 = vmatpush3.msra.mxu0 %v369_v22 }
  0xb6   : > { %1283 = vmatmul.mubr.f32.vlgmr.msra.gmra.mxu0 %v1700_v13 }
 0x13b   : > { %v569_v30 = vpop.f32.mrf.mxu1 }
 0x13d   : > { %v571_v13 = vpop.f32.mrf.mxu1 }
 0x156   : > { %v498_v31 = vpop.f32.mrf.mxu0 }
 0x157   : > { %v499_v32 = vadd.f32 %v498_v31, %v420_v28 }
 0x158   : > { %v500_v33 = vpop.f32.mrf.mxu0 }
 0x159   : > { %v501_v34 = vadd.f32 %v500_v33, %v424_v29  ;;  %v570_v36 = vadd.f32 %v569_v30, %v499_v32 }
 0x15b   : > { %v572_v35 = vadd.f32 %v571_v13, %v501_v34 }
 0x15d   : > { %744 = vmatprep.subr.mxu1 %v572_v35  ;;  %778 = vmatprep.mubr.f32.mxu1 %v572_v35 }
 0x15e   : > { %745 = vmatpush1.xpose.msra.mxu1 %v570_v36  ;;  %v1226_v37 = vpop.f32.mrf.mxu1 }
 0x15f   : > { %1285 = vmatprep.subr.mxu1 %v1531_v0 }
 0x160   : > { %v1227_v39 = vpop.f32.mrf.mxu1 }
 0x161   : > { %779 = vmatmul.mubr.f32.vlgmr.msra.gmra.mxu1 %v570_v36  ;;  %v1228_v40 = vadd.f32 %v1227_v39, %v1226_v37 }
 0x162   : > { %1287 = vmatprep.mubr.msk.f32.mxu1 %vm1532_vm0, %v1531_v0 }
 0x163   : > { %v641_v42 = vadd.f32 %v1228_v40, %v428_v41 }
 0x176   : > { %v710_v43 = vpop.f32.mrf.mxu0 }
 0x177   : > { %v711_v44 = vadd.f32 %v710_v43, %v641_v42 }
 0x178   : > { %v1284_v45 = vpop.f32.mrf.mxu0 }
 0x179   : > { %1286 = vmatpush3.xpose.msra.mxu1 %v711_v44 }
 0x17a   : > { %900 = vmatprep.subr.mxu1 %v572_v35 }
 0x17c   : > { %1288 = vmatmul.mubr.f32.vlgmr.msra.gmra.mxu1 %v711_v44 }
 0x17d   : > { %901 = vmatpush1.msra.mxu1 %v570_v36  ;;  %934 = vmatprep.mubr.f32.mxu1 %v1531_v0 }
 0x17e   : > { %1290 = vmatprep.subr.mxu1 %v1531_v0 }
 0x221   : > { %v780_v46 = vpop.f32.mrf.mxu1 }
 0x223   : > { %v782_v47 = vpop.f32.mrf.mxu1 }
 0x23c   : > { %v850_v48 = vpop.f32.mrf.mxu1 }
 0x23d   : > { %v851_v49 = vadd.f32 %v850_v48, %v780_v46 }
 0x23e   : > { %v1289_v50 = vpop.f32.mrf.mxu1 }
 0x23f   : > { %v854_v51 = vmul.f32 0.05103104, %v851_v49 }
 0x241   : > { %v856_v52 = vsel %vm855_vm1, %v854_v51, -inf }
 0x242   : > { %857 = vmax.xlane.f32.xlu0 %v856_v52 }
 0x2cb   : > { %v858_v53 = vpop.xlane.xlu0 %857 }
 0x2cc   : > { %v859_v54 = vsub.f32 %v854_v51, %v858_v53 }
 0x2ce   : > { %v860_v55 = vmul.f32 1.442695, %v859_v54 }
 0x2d0   : > { %1370 = vpow2.f32 %v860_v55 }
 0x2dd   : > { %v1371_v56 = vpop.eup %1370 }
 0x2de   : > { %v862_v57 = vsel %vm855_vm1, %v1371_v56, 0.0 }
 0x2df   : > { %863 = vadd.xlane.f32.xlu0 %v862_v57 }
 0x368   : > { %v864_v58 = vpop.xlane.xlu0 %863 }
 0x369   : > { %1372 = vrcp.f32 %v864_v58 }
 0x376   : > { %v1373_v59 = vpop.eup %1372 }
 0x377   : > { %v866_v60 = vmul.f32 %v1373_v59, %v1371_v56 }
 0x379   : > { %1189 = vmatmul.mubr.msk.f32.vlgmr.msra.gmra.mxu1 %vm855_vm1, %v866_v60 }
 0x37a   : > { %1291 = vmatpush3.msra.mxu1 %v711_v44  ;;  %1292 = vmatprep.mubr.msk.f32.mxu1 %vm1532_vm0, %v1531_v0 }
 0x37d   : > { %1293 = vmatmul.mubr.msk.f32.vlgmr.msra.gmra.mxu1 %vm855_vm1, %v866_v60 }
 0x439   : > { %v936_v61 = vpop.f32.mrf.mxu1 }
 0x43b   : > { %v938_v62 = vpop.f32.mrf.mxu1 }
 0x43c   : > { %v1013_v63 = vadd.f32 %v938_v62, %v936_v61 }
 0x43d   : > { %v1007_v1 = vpop.f32.mrf.mxu1 }
 0x43e   : > { %v1014_v2 = vadd.f32 %v1013_v63, %v1007_v1 }
 0x43f   : > { %v1294_v3 = vpop.f32.mrf.mxu1 }
 0x440   : > { %1015 = vadd.xlane.f32.xlu1 %v1014_v2 }
 0x4c9   : > { %v1016_v4 = vpop.xlane.xlu1 %1015 }
 0x4ca   : > { %v1018_v5 = vmul.f32 0.0026041667, %v1016_v4 }
 0x4cc   : > { %v1019_v6 = vsub.f32 %v936_v61, %v1018_v5  ;;  %v1020_v7 = vsub.f32 %v938_v62, %v1018_v5  ;;  %v1021_v8 = vsub.f32 %v1007_v1, %v1018_v5 }
 0x4ce   : > { %v1022_v9 = vmul.f32 %v1019_v6, %v1019_v6  ;;  %v1023_v10 = vmul.f32 %v1020_v7, %v1020_v7  ;;  %v1024_v11 = vmul.f32 %v1021_v8, %v1021_v8 }
 0x4d0   : > { %v1025_v12 = vadd.f32 %v1023_v10, %v1022_v9 }
 0x4d2   : > { %v1026_v14 = vadd.f32 %v1025_v12, %v1024_v11 }
 0x4d4   : > { %1027 = vadd.xlane.f32.xlu1 %v1026_v14 }
 0x55d   : > { %v1028_v0 = vpop.xlane.xlu1 %1027 }
 0x55e   : > { %v1029_v15 = vmul.f32 0.0026041667, %v1028_v0 }
 0x560   : > { %v1030_v16 = vadd.f32 1e-12, %v1029_v15 }
 0x562   : > { %1374 = vrsqrt.f32 %v1030_v16 }
 0x56f   : > { %v1375_v22 = vpop.eup %1374 }
 0x570   : > { %v1032_v28 = vmul.f32 %v1375_v22, %v1019_v6  ;;  %v1033_v29 = vmul.f32 %v1375_v22, %v1020_v7  ;;  %v1034_v30 = vmul.f32 %v1375_v22, %v1021_v8 }
 0x572   : > { %v1051_v31 = vmul.f32 %v1039_v19, %v1032_v28  ;;  %v1052_v32 = vmul.f32 %v1043_v20, %v1033_v29  ;;  %v1053_v33 = vmul.f32 %v1047_v21, %v1034_v30 }
 0x574   : > { %v1070_v34 = vadd.f32 %v1058_v23, %v1051_v31  ;;  %v1071_v13 = vadd.f32 %v1062_v24, %v1052_v32  ;;  %v1072_v35 = vadd.f32 %v1066_v26, %v1053_v33 }
 0x576   : > { %1073 = vst [vmem:[%s267_s13] sm:$0xff] %v1070_v34  ;;  %1074 = vst [vmem:[%s267_s13 + $0x8] sm:$0xff] %v1071_v13 }
 0x577   : > { %1075 = vst [vmem:[%s267_s13 + $0x10] sm:$0xff] %v1072_v35 }
 0x578   : > { %1469 = shalt.err (!%p1466_p0)
}
 0x579   : > { %s1470_s23 = scalar_lea.hbm %s1766_s29, 384  ;;  %s1474_s26 = scalar_lea.hbm %s1814_s5, 768 }
 0x57a   : > { %p1471_p5 = scmp.ne.s32.totalorder %s1766_s29, %s1470_s23  ;;  %p1475_p4 = scmp.lt.s32.totalorder %s1766_s29, %s1814_s5 }
 0x57b   : > { %p1476_p6 = scmp.lt.s32.totalorder %s1474_s26, %s1470_s23 }
 0x57c   : > { %p1472_p3 = pnand %p1471_p5, %p1830_p11 }
 0x57d   : > { %p1477_p8 = por %p1476_p6, %p1475_p4 }
 0x57e   : > { %p1473_p1 = pneg %p1472_p3 }
 0x580   : > { %p1478_p9 = pnand %p1477_p8, %p1473_p1 }
 0x582   : > { %1481 = shalt.err (!%p1478_p9)
}
 0x583   : > { %1309 = dma.vmem_to_hbm [thread:$0]  (%p1830_p11), %s1768_s8, 384, %s1766_s29, %s1077_s22  }
 0x584 PF: > { %s1103_s12 = sand.u32 1, %s1512_s18   ;;  %p1831_p10 = scmp.ne.s32.totalorder %s1820_s25, 0 }
 0x585   : > { %p1832_p2 = scmp.ge.s32.totalorder %s1524_s21, 2  ;;  %s1104_s13 = scalar_lea.sflag [#allocation4], %s1103_s12 }
 0x587   : > { %p1323_p12 = pnand %p1832_p2, %p1831_p10 }
 0x589   : > { %p1324_p7 = pneg %p1323_p12 }
 0x58b   : > { %1507 = dma.done.wait (%p1324_p7), %s1104_s13, 384  }
 0x58c   : > { %1509 = vsyncadd (%p1324_p7), %s1104_s13, 4294966912  ;;  %p19_p13 = scmp.ge.s32.totalorder %s1636_s16, 4   ;;  %s1833_s18 = smov %s1516_s19 }
 0x58d   : > { %s1834_s19 = smov %s1520_s20  ;;  %s1835_s20 = smov %s1652_s28 }
 0x58e   : > { %s1836_s21 = smov %s1636_s16  ;;  %21 = sbr.rel (!%p19_p13) target bundleno = 6 (0x6), region = 93 }
 0x593   :  { %1109 = vsyncpa [#allocation3], 1 }
 0x594   :  { %1111 = vsyncpa [#allocation3 + $0x1], 1 }
 0x595   :  { %1112 = vsyncpa [#allocation6], 1 }
 0x596   :  { %1113 = vsyncpa [#allocation4], 1 }
 0x597   :  { %1115 = vsyncpa [#allocation4 + $0x1], 1 }

</bundles_post_ra>
